<compile_context>
chip_gen: v7x
topology: tpu7x:2x2x1
jax: 0.10.0
libtpu: 0.0.40
codegen_flags: <defaults>
</compile_context>

<pallas_src>
import functools

import jax
import jax.numpy as jnp
from jax.experimental import pallas as pl
from jax.experimental.pallas import tpu as pltpu

_LANE = 128
_SMOOTH = 1e-05
_PAD_LOGIT = -1e4  # exp(-|pad|) == 0 in f32 -> padded elements contribute 0 everywhere


def _bce_dice_kernel(x_ref, t_ref, out_ref,
                     acc_bce, acc_inter, acc_sig, acc_t,
                     *, inv_nd, inv_n):
    k = pl.program_id(0)

    @pl.when(k == 0)
    def _():
        acc_bce[...] = jnp.zeros_like(acc_bce)
        acc_inter[...] = jnp.zeros_like(acc_inter)
        acc_sig[...] = jnp.zeros_like(acc_sig)
        acc_t[...] = jnp.zeros_like(acc_t)

    x = x_ref[...].astype(jnp.float32)   # (N, TILE_R, 128)
    t = t_ref[...].astype(jnp.float32)

    # Shared transcendental: e = exp(-|x|) feeds both BCE and sigmoid.
    e = jnp.exp(-jnp.abs(x))
    # Stable BCE with logits: max(x,0) - x*t + log(1 + exp(-|x|))
    acc_bce[...] += jnp.maximum(x, 0.0) - x * t + jnp.log1p(e)
    # sigmoid(x) = 1/(1+e) if x>=0 else e/(1+e)  (exact division for accuracy)
    sig = jnp.where(x >= 0.0, 1.0, e) / (1.0 + e)
    acc_inter[...] += sig * t
    acc_sig[...] += sig
    acc_t[...] += t

    @pl.when(k == pl.num_programs(0) - 1)
    def _():
        # Lane reduce, then sublane reduce; keep everything >= 2-D.
        bce_rows = jnp.sum(acc_bce[...], axis=2)                          # (N, TILE_R)
        bce_sum = jnp.sum(jnp.sum(bce_rows, axis=1, keepdims=True),
                          axis=0, keepdims=True)                          # (1, 1)
        inter = jnp.sum(jnp.sum(acc_inter[...], axis=2), axis=1, keepdims=True)  # (N, 1)
        ssum = jnp.sum(jnp.sum(acc_sig[...], axis=2), axis=1, keepdims=True)     # (N, 1)
        tsum = jnp.sum(jnp.sum(acc_t[...], axis=2), axis=1, keepdims=True)       # (N, 1)

        dice = (2.0 * inter + _SMOOTH) / (ssum + tsum + _SMOOTH)          # (N, 1)
        dice_loss = 1.0 - jnp.sum(dice, axis=0, keepdims=True) * inv_n    # (1, 1)
        out_ref[...] = 0.5 * (bce_sum * inv_nd) + dice_loss


def bce_dice_loss(logits, target):
    """0.5 * BCEWithLogits(mean) + (1 - mean per-sample dice)."""
    if target.shape != logits.shape:
        # Mirror the PyTorch branch: NHWC target -> NCHW.
        target = jnp.transpose(target, (0, 3, 1, 2))

    n = logits.shape[0]
    d = 1
    for s in logits.shape[1:]:
        d *= s

    x = logits.reshape(n, d)
    t = target.reshape(n, d)

    # Tile sizing: rows of 128 lanes; keep (2 inputs x 2 buffers) + 4 f32
    # accumulators within a conservative VMEM budget (portable incl. v5e).
    r_total = -(-d // _LANE)
    in_bytes = jnp.dtype(x.dtype).itemsize + jnp.dtype(t.dtype).itemsize
    row_bytes = n * _LANE * (2 * in_bytes + 4 * 4)
    budget = 8 * 1024 * 1024
    cap = max(8, (budget // row_bytes) // 8 * 8)
    if r_total <= cap:
        tile_r = ((r_total + 7) // 8) * 8
    else:
        tile_r = cap
    r_pad = ((r_total + tile_r - 1) // tile_r) * tile_r
    d_pad = r_pad * _LANE

    if d_pad != d:
        # Padding contributes exactly zero to BCE, sigmoid and target sums.
        x = jnp.pad(x, ((0, 0), (0, d_pad - d)), constant_values=_PAD_LOGIT)
        t = jnp.pad(t, ((0, 0), (0, d_pad - d)), constant_values=0.0)

    x3 = x.reshape(n, r_pad, _LANE)
    t3 = t.reshape(n, r_pad, _LANE)
    nk = r_pad // tile_r

    kernel = functools.partial(
        _bce_dice_kernel,
        inv_nd=1.0 / float(n * d),
        inv_n=1.0 / float(n),
    )

    out = pl.pallas_call(
        kernel,
        out_shape=jax.ShapeDtypeStruct((1, 1), jnp.float32),
        grid_spec=pltpu.PrefetchScalarGridSpec(
            num_scalar_prefetch=0,
            grid=(nk,),
            in_specs=[
                pl.BlockSpec((n, tile_r, _LANE), lambda k: (0, k, 0)),
                pl.BlockSpec((n, tile_r, _LANE), lambda k: (0, k, 0)),
            ],
            out_specs=pl.BlockSpec((1, 1), lambda k: (0, 0)),
            scratch_shapes=[pltpu.VMEM((n, tile_r, _LANE), jnp.float32)] * 4,
        ),
        compiler_params=pltpu.CompilerParams(
            dimension_semantics=("arbitrary",),
            vmem_limit_bytes=32 * 1024 * 1024,
        ),
    )(x3, t3)
    return out[0, 0]


def _reference(logits, target):
    """Pure-JAX reference reproducing the PyTorch forward."""
    if target.shape != logits.shape:
        target = jnp.transpose(target, (0, 3, 1, 2))
    x = logits.astype(jnp.float32)
    t = target.astype(jnp.float32)
    bce_elem = jnp.maximum(x, 0.0) - x * t + jnp.log1p(jnp.exp(-jnp.abs(x)))
    bce = jnp.mean(bce_elem)
    n = x.shape[0]
    xs = jax.nn.sigmoid(x).reshape(n, -1)
    ts = t.reshape(n, -1)
    inter = jnp.sum(xs * ts, axis=1)
    dice = (2.0 * inter + _SMOOTH) / (jnp.sum(xs, axis=1) + jnp.sum(ts, axis=1) + _SMOOTH)
    dice = 1.0 - jnp.sum(dice) / n
    return 0.5 * bce + dice


if __name__ == "__main__":
    key = jax.random.PRNGKey(0)
    k1, k2, k3, k4 = jax.random.split(key, 4)

    # Test 1: small shapes; logits NCHW, target NHWC (exercises the permute branch).
    logits = jax.random.normal(k1, (2, 4, 16, 16), dtype=jnp.float32)
    target = jax.random.uniform(k2, (2, 16, 16, 4), dtype=jnp.float32)
    loss = jax.block_until_ready(bce_dice_loss(logits, target))
    ref = jax.block_until_ready(_reference(logits, target))
    assert jnp.allclose(loss, ref, rtol=1e-5, atol=1e-5), (loss, ref)

    # Test 2: larger spatial size -> multi-step grid + lane padding path.
    logits2 = jax.random.normal(k3, (2, 4, 192, 192), dtype=jnp.float32)
    target2 = jax.random.uniform(k4, (2, 4, 192, 192), dtype=jnp.float32)
    loss2 = jax.block_until_ready(bce_dice_loss(logits2, target2))
    ref2 = jax.block_until_ready(_reference(logits2, target2))
    assert jnp.allclose(loss2, ref2, rtol=1e-5, atol=5e-5), (loss2, ref2)

    print("KERNEL_OK")
</pallas_src>

<mosaic_0001>
module attributes {stable_mosaic.version = 11 : i64} {
  func.func @_bce_dice_kernel(%arg0: i32, %arg1: memref<2x8x128xf32, #tpu.memory_space<vmem>>, %arg2: memref<2x8x128xf32, #tpu.memory_space<vmem>>, %arg3: memref<1x1xf32, #tpu.memory_space<vmem>>, %arg4: memref<2x8x128xf32, #tpu.memory_space<vmem>>, %arg5: memref<2x8x128xf32, #tpu.memory_space<vmem>>, %arg6: memref<2x8x128xf32, #tpu.memory_space<vmem>>, %arg7: memref<2x8x128xf32, #tpu.memory_space<vmem>>) attributes {dimension_semantics = [#tpu.dimension_semantics<arbitrary>], iteration_bounds = array<i64: 1>, scalar_prefetch = 0 : i64, scratch_operands = 4 : i64, tpu.core_type = #tpu.core_type<tc>, window_params = [{transform_indices = @transform_0, window_bounds = array<i64: 2, 8, 128>}, {transform_indices = @transform_1, window_bounds = array<i64: 2, 8, 128>}, {pipeline_mode = #tpu.pipeline_mode<synchronous>, transform_indices = @transform_2, window_bounds = array<i64: 1, 1>}]} {
    %c0_i32 = arith.constant 0 : i32
    %0 = arith.cmpi eq, %arg0, %c0_i32 : i32
    %1 = arith.extui %0 : i1 to i32
    %c0_i32_0 = arith.constant 0 : i32
    %2 = arith.cmpi ne, %1, %c0_i32_0 : i32
    scf.if %2 {
      %cst_36 = arith.constant 0.000000e+00 : f32
      %38 = vector.broadcast %cst_36 : f32 to vector<2x8x128xf32>
      %c0_37 = arith.constant 0 : index
      %c0_38 = arith.constant 0 : index
      %c0_39 = arith.constant 0 : index
      %39 = vector.load %arg4[%c0_37, %c0_38, %c0_39] : memref<2x8x128xf32, #tpu.memory_space<vmem>>, vector<2x8x128xf32>
      tpu.vector_store %arg4[%c0_37, %c0_38, %c0_39], %38 {strides = array<i32>} : memref<2x8x128xf32, #tpu.memory_space<vmem>>, vector<2x8x128xf32>,
      %cst_40 = arith.constant 0.000000e+00 : f32
      %40 = vector.broadcast %cst_40 : f32 to vector<2x8x128xf32>
      %c0_41 = arith.constant 0 : index
      %c0_42 = arith.constant 0 : index
      %c0_43 = arith.constant 0 : index
      %41 = vector.load %arg5[%c0_41, %c0_42, %c0_43] : memref<2x8x128xf32, #tpu.memory_space<vmem>>, vector<2x8x128xf32>
      tpu.vector_store %arg5[%c0_41, %c0_42, %c0_43], %40 {strides = array<i32>} : memref<2x8x128xf32, #tpu.memory_space<vmem>>, vector<2x8x128xf32>,
      %cst_44 = arith.constant 0.000000e+00 : f32
      %42 = vector.broadcast %cst_44 : f32 to vector<2x8x128xf32>
      %c0_45 = arith.constant 0 : index
      %c0_46 = arith.constant 0 : index
      %c0_47 = arith.constant 0 : index
      %43 = vector.load %arg6[%c0_45, %c0_46, %c0_47] : memref<2x8x128xf32, #tpu.memory_space<vmem>>, vector<2x8x128xf32>
      tpu.vector_store %arg6[%c0_45, %c0_46, %c0_47], %42 {strides = array<i32>} : memref<2x8x128xf32, #tpu.memory_space<vmem>>, vector<2x8x128xf32>,
      %cst_48 = arith.constant 0.000000e+00 : f32
      %44 = vector.broadcast %cst_48 : f32 to vector<2x8x128xf32>
      %c0_49 = arith.constant 0 : index
      %c0_50 = arith.constant 0 : index
      %c0_51 = arith.constant 0 : index
      %45 = vector.load %arg7[%c0_49, %c0_50, %c0_51] : memref<2x8x128xf32, #tpu.memory_space<vmem>>, vector<2x8x128xf32>
      tpu.vector_store %arg7[%c0_49, %c0_50, %c0_51], %44 {strides = array<i32>} : memref<2x8x128xf32, #tpu.memory_space<vmem>>, vector<2x8x128xf32>,
    } else {
    }
    %c0 = arith.constant 0 : index
    %c0_1 = arith.constant 0 : index
    %c0_2 = arith.constant 0 : index
    %3 = vector.load %arg1[%c0, %c0_1, %c0_2] : memref<2x8x128xf32, #tpu.memory_space<vmem>>, vector<2x8x128xf32>
    %c0_3 = arith.constant 0 : index
    %c0_4 = arith.constant 0 : index
    %c0_5 = arith.constant 0 : index
    %4 = vector.load %arg2[%c0_3, %c0_4, %c0_5] : memref<2x8x128xf32, #tpu.memory_space<vmem>>, vector<2x8x128xf32>
    %5 = math.absf %3 : vector<2x8x128xf32>
    %cst = arith.constant 0.000000e+00 : f32
    %6 = vector.broadcast %cst : f32 to vector<2x8x128xf32>
    %7 = arith.subf %6, %5 : vector<2x8x128xf32>
    %8 = math.exp %7 : vector<2x8x128xf32>
    %c0_6 = arith.constant 0 : index
    %c0_7 = arith.constant 0 : index
    %c0_8 = arith.constant 0 : index
    %9 = vector.load %arg4[%c0_6, %c0_7, %c0_8] : memref<2x8x128xf32, #tpu.memory_space<vmem>>, vector<2x8x128xf32>
    %cst_9 = arith.constant 0.000000e+00 : f32
    %10 = vector.broadcast %cst_9 : f32 to vector<2x8x128xf32>
    %11 = arith.maximumf %3, %10 : vector<2x8x128xf32>
    %12 = arith.mulf %3, %4 : vector<2x8x128xf32>
    %13 = arith.subf %11, %12 : vector<2x8x128xf32>
    %14 = math.log1p %8 : vector<2x8x128xf32>
    %15 = arith.addf %13, %14 : vector<2x8x128xf32>
    %16 = arith.addf %9, %15 : vector<2x8x128xf32>
    %c0_10 = arith.constant 0 : index
    %c0_11 = arith.constant 0 : index
    %c0_12 = arith.constant 0 : index
    %17 = vector.load %arg4[%c0_10, %c0_11, %c0_12] : memref<2x8x128xf32, #tpu.memory_space<vmem>>, vector<2x8x128xf32>
    tpu.vector_store %arg4[%c0_10, %c0_11, %c0_12], %16 {strides = array<i32>} : memref<2x8x128xf32, #tpu.memory_space<vmem>>, vector<2x8x128xf32>,
    %cst_13 = arith.constant 0.000000e+00 : f32
    %18 = vector.broadcast %cst_13 : f32 to vector<2x8x128xf32>
    %19 = arith.cmpf oge, %3, %18 : vector<2x8x128xf32>
    %cst_14 = arith.constant 1.000000e+00 : f32
    %20 = vector.broadcast %cst_14 : f32 to vector<2x8x128xf32>
    %21 = arith.select %19, %20, %8 : vector<2x8x128xi1>, vector<2x8x128xf32>
    %cst_15 = arith.constant 1.000000e+00 : f32
    %22 = vector.broadcast %cst_15 : f32 to vector<2x8x128xf32>
    %23 = arith.addf %22, %8 : vector<2x8x128xf32>
    %24 = arith.divf %21, %23 : vector<2x8x128xf32>
    %c0_16 = arith.constant 0 : index
    %c0_17 = arith.constant 0 : index
    %c0_18 = arith.constant 0 : index
    %25 = vector.load %arg5[%c0_16, %c0_17, %c0_18] : memref<2x8x128xf32, #tpu.memory_space<vmem>>, vector<2x8x128xf32>
    %26 = arith.mulf %24, %4 : vector<2x8x128xf32>
    %27 = arith.addf %25, %26 : vector<2x8x128xf32>
    %c0_19 = arith.constant 0 : index
    %c0_20 = arith.constant 0 : index
    %c0_21 = arith.constant 0 : index
    %28 = vector.load %arg5[%c0_19, %c0_20, %c0_21] : memref<2x8x128xf32, #tpu.memory_space<vmem>>, vector<2x8x128xf32>
    tpu.vector_store %arg5[%c0_19, %c0_20, %c0_21], %27 {strides = array<i32>} : memref<2x8x128xf32, #tpu.memory_space<vmem>>, vector<2x8x128xf32>,
    %c0_22 = arith.constant 0 : index
    %c0_23 = arith.constant 0 : index
    %c0_24 = arith.constant 0 : index
    %29 = vector.load %arg6[%c0_22, %c0_23, %c0_24] : memref<2x8x128xf32, #tpu.memory_space<vmem>>, vector<2x8x128xf32>
    %30 = arith.addf %29, %24 : vector<2x8x128xf32>
    %c0_25 = arith.constant 0 : index
    %c0_26 = arith.constant 0 : index
    %c0_27 = arith.constant 0 : index
    %31 = vector.load %arg6[%c0_25, %c0_26, %c0_27] : memref<2x8x128xf32, #tpu.memory_space<vmem>>, vector<2x8x128xf32>
    tpu.vector_store %arg6[%c0_25, %c0_26, %c0_27], %30 {strides = array<i32>} : memref<2x8x128xf32, #tpu.memory_space<vmem>>, vector<2x8x128xf32>,
    %c0_28 = arith.constant 0 : index
    %c0_29 = arith.constant 0 : index
    %c0_30 = arith.constant 0 : index
    %32 = vector.load %arg7[%c0_28, %c0_29, %c0_30] : memref<2x8x128xf32, #tpu.memory_space<vmem>>, vector<2x8x128xf32>
    %33 = arith.addf %32, %4 : vector<2x8x128xf32>
    %c0_31 = arith.constant 0 : index
    %c0_32 = arith.constant 0 : index
    %c0_33 = arith.constant 0 : index
    %34 = vector.load %arg7[%c0_31, %c0_32, %c0_33] : memref<2x8x128xf32, #tpu.memory_space<vmem>>, vector<2x8x128xf32>
    tpu.vector_store %arg7[%c0_31, %c0_32, %c0_33], %33 {strides = array<i32>} : memref<2x8x128xf32, #tpu.memory_space<vmem>>, vector<2x8x128xf32>,
    %c0_i32_34 = arith.constant 0 : i32
    %35 = arith.cmpi eq, %arg0, %c0_i32_34 : i32
    %36 = arith.extui %35 : i1 to i32
    %c0_i32_35 = arith.constant 0 : i32
    %37 = arith.cmpi ne, %36, %c0_i32_35 : i32
    scf.if %37 {
      %c0_36 = arith.constant 0 : index
      %c0_37 = arith.constant 0 : index
      %c0_38 = arith.constant 0 : index
      %38 = vector.load %arg4[%c0_36, %c0_37, %c0_38] : memref<2x8x128xf32, #tpu.memory_space<vmem>>, vector<2x8x128xf32>
      %cst_39 = arith.constant dense<0.000000e+00> : vector<2x8xf32>
      %39 = vector.multi_reduction <add>, %38, %cst_39 [2] : vector<2x8x128xf32> to vector<2x8xf32>
      %cst_40 = arith.constant dense<0.000000e+00> : vector<2xf32>
      %40 = vector.multi_reduction <add>, %39, %cst_40 [1] : vector<2x8xf32> to vector<2xf32>
      %41 = vector.shape_cast %40 : vector<2xf32> to vector<2x1xf32>
      %cst_41 = arith.constant dense<0.000000e+00> : vector<1xf32>
      %42 = vector.multi_reduction <add>, %41, %cst_41 [0] : vector<2x1xf32> to vector<1xf32>
      %43 = vector.shape_cast %42 : vector<1xf32> to vector<1x1xf32>
      %c0_42 = arith.constant 0 : index
      %c0_43 = arith.constant 0 : index
      %c0_44 = arith.constant 0 : index
      %44 = vector.load %arg5[%c0_42, %c0_43, %c0_44] : memref<2x8x128xf32, #tpu.memory_space<vmem>>, vector<2x8x128xf32>
      %cst_45 = arith.constant dense<0.000000e+00> : vector<2x8xf32>
      %45 = vector.multi_reduction <add>, %44, %cst_45 [2] : vector<2x8x128xf32> to vector<2x8xf32>
      %cst_46 = arith.constant dense<0.000000e+00> : vector<2xf32>
      %46 = vector.multi_reduction <add>, %45, %cst_46 [1] : vector<2x8xf32> to vector<2xf32>
      %47 = vector.shape_cast %46 : vector<2xf32> to vector<2x1xf32>
      %c0_47 = arith.constant 0 : index
      %c0_48 = arith.constant 0 : index
      %c0_49 = arith.constant 0 : index
      %48 = vector.load %arg6[%c0_47, %c0_48, %c0_49] : memref<2x8x128xf32, #tpu.memory_space<vmem>>, vector<2x8x128xf32>
      %cst_50 = arith.constant dense<0.000000e+00> : vector<2x8xf32>
      %49 = vector.multi_reduction <add>, %48, %cst_50 [2] : vector<2x8x128xf32> to vector<2x8xf32>
      %cst_51 = arith.constant dense<0.000000e+00> : vector<2xf32>
      %50 = vector.multi_reduction <add>, %49, %cst_51 [1] : vector<2x8xf32> to vector<2xf32>
      %51 = vector.shape_cast %50 : vector<2xf32> to vector<2x1xf32>
      %c0_52 = arith.constant 0 : index
      %c0_53 = arith.constant 0 : index
      %c0_54 = arith.constant 0 : index
      %52 = vector.load %arg7[%c0_52, %c0_53, %c0_54] : memref<2x8x128xf32, #tpu.memory_space<vmem>>, vector<2x8x128xf32>
      %cst_55 = arith.constant dense<0.000000e+00> : vector<2x8xf32>
      %53 = vector.multi_reduction <add>, %52, %cst_55 [2] : vector<2x8x128xf32> to vector<2x8xf32>
      %cst_56 = arith.constant dense<0.000000e+00> : vector<2xf32>
      %54 = vector.multi_reduction <add>, %53, %cst_56 [1] : vector<2x8xf32> to vector<2xf32>
      %55 = vector.shape_cast %54 : vector<2xf32> to vector<2x1xf32>
      %cst_57 = arith.constant 2.000000e+00 : f32
      %56 = vector.broadcast %cst_57 : f32 to vector<2x1xf32>
      %57 = arith.mulf %56, %47 : vector<2x1xf32>
      %cst_58 = arith.constant 9.99999974E-6 : f32
      %58 = vector.broadcast %cst_58 : f32 to vector<2x1xf32>
      %59 = arith.addf %57, %58 : vector<2x1xf32>
      %60 = arith.addf %51, %55 : vector<2x1xf32>
      %cst_59 = arith.constant 9.99999974E-6 : f32
      %61 = vector.broadcast %cst_59 : f32 to vector<2x1xf32>
      %62 = arith.addf %60, %61 : vector<2x1xf32>
      %63 = arith.divf %59, %62 : vector<2x1xf32>
      %cst_60 = arith.constant dense<0.000000e+00> : vector<1xf32>
      %64 = vector.multi_reduction <add>, %63, %cst_60 [0] : vector<2x1xf32> to vector<1xf32>
      %65 = vector.shape_cast %64 : vector<1xf32> to vector<1x1xf32>
      %cst_61 = arith.constant 5.000000e-01 : f32
      %66 = vector.broadcast %cst_61 : f32 to vector<1x1xf32>
      %67 = arith.mulf %65, %66 : vector<1x1xf32>
      %cst_62 = arith.constant 1.000000e+00 : f32
      %68 = vector.broadcast %cst_62 : f32 to vector<1x1xf32>
      %69 = arith.subf %68, %67 : vector<1x1xf32>
      %cst_63 = arith.constant 4.8828125E-4 : f32
      %70 = vector.broadcast %cst_63 : f32 to vector<1x1xf32>
      %71 = arith.mulf %43, %70 : vector<1x1xf32>
      %cst_64 = arith.constant 5.000000e-01 : f32
      %72 = vector.broadcast %cst_64 : f32 to vector<1x1xf32>
      %73 = arith.mulf %72, %71 : vector<1x1xf32>
      %74 = arith.addf %73, %69 : vector<1x1xf32>
      %c0_65 = arith.constant 0 : index
      %c0_66 = arith.constant 0 : index
      %75 = vector.load %arg3[%c0_65, %c0_66] : memref<1x1xf32, #tpu.memory_space<vmem>>, vector<1x1xf32>
      tpu.vector_store %arg3[%c0_65, %c0_66], %74 {strides = array<i32>} : memref<1x1xf32, #tpu.memory_space<vmem>>, vector<1x1xf32>,
    } else {
    }
    return
  }
  func.func @transform_0(%arg0: i32) -> (i32, i32, i32) {
    %c0_i32 = arith.constant 0 : i32
    %c0_i32_0 = arith.constant 0 : i32
    %c0_i32_1 = arith.constant 0 : i32
    return %c0_i32, %arg0, %c0_i32_0 : i32, i32, i32
  }
  func.func @transform_1(%arg0: i32) -> (i32, i32, i32) {
    %c0_i32 = arith.constant 0 : i32
    %c0_i32_0 = arith.constant 0 : i32
    %c0_i32_1 = arith.constant 0 : i32
    return %c0_i32, %arg0, %c0_i32_0 : i32, i32, i32
  }
  func.func @transform_2(%arg0: i32) -> (i32, i32) {
    %c0_i32 = arith.constant 0 : i32
    %c0_i32_0 = arith.constant 0 : i32
    %c0_i32_1 = arith.constant 0 : i32
    return %c0_i32, %c0_i32_0 : i32, i32
  }
}

</mosaic_0001>

<bundles_post_ra>
// kernel: tpu_custom_call.1
= control target key start
LH: loop header
LB: loop body
LE: loop exit
PB: predicated region body
PF: predicated region fallthrough
CT: control target
= control target key end

     0   :  { %7 = vsyncpa [#allocation7], 0  ;;  %s416_s0 = inlined_call_operand.hbm [shape: f32[2,8,128], index: 0, kind: input, shape index: {}]   ;;  %s417_s1 = inlined_call_operand.hbm [shape: f32[2,8,128], index: 1, kind: input, shape index: {}]   ;;  %s418_s2 = inlined_call_operand.hbm [shape: f32[1,1], index: 2, kind: output, shape index: {}]  }
   0x1   :  { %8 = vsyncpa [#allocation10], 0 }
   0x2   :  { %9 = vsyncpa [#allocation8], 0  ;;  %s352_s9 = smov [#allocation6]   ;;  %s280_s13 = scalar_lea.hbm %s416_s0, 256 }
   0x3   :  { %s15_s10 = sshll.u32 %s352_s9, 4  ;;  %p281_p0 = scmp.ne.s32.totalorder %s416_s0, %s280_s13  ;;  %s16_s10 = int_to_ptr.vmem [resolvable:$true] %s15_s10 }
   0x4   :  { %p284_p1 = scmp.lt.u32.totalorder %s280_s13, %s416_s0 }
   0x6   :  { %p286_p2 = pnand %p284_p1, %p281_p0 }
   0x8   :  { %289 = shalt.err (!%p286_p2)
}
   0x9   :  { %s290_s18 = scalar_lea.vmem %s16_s10, 256  ;;  %p295_p4 = scmp.lt.s32.totalorder %s16_s10, %s16_s10 }
   0xa   :  { %p291_p3 = scmp.ne.s32.totalorder %s16_s10, %s290_s18  ;;  %p296_p5 = scmp.lt.s32.totalorder %s290_s18, %s290_s18 }
   0xc   :  { %p297_p6 = por %p296_p5, %p295_p4 }
   0xe   :  { %p298_p7 = pnand %p297_p6, %p291_p3 }
  0x10   :  { %301 = shalt.err (!%p298_p7)
}
  0x11   :  { %s353_s19 = smov 128   ;;  %s354_s20 = smov 8  }
  0x12   :  { %21 = dma.hbm_to_vmem [thread:$0]  %s416_s0, 256, %s16_s10, [#allocation7], %s353_s19, %s353_s19, %s354_s20  }
  0x13   :  { %s355_s23 = smov [#allocation9]   ;;  %s302_s27 = scalar_lea.hbm %s417_s1, 256 }
  0x14   :  { %s27_s24 = sshll.u32 %s355_s23, 4  ;;  %p303_p8 = scmp.ne.s32.totalorder %s417_s1, %s302_s27  ;;  %s28_s24 = int_to_ptr.vmem [resolvable:$true] %s27_s24 }
  0x15   :  { %p306_p9 = scmp.lt.u32.totalorder %s302_s27, %s417_s1 }
  0x17   :  { %p308_p10 = pnand %p306_p9, %p303_p8 }
  0x19   :  { %311 = shalt.err (!%p308_p10)
}
  0x1a   :  { %s312_s4 = scalar_lea.vmem %s28_s24, 256  ;;  %p317_p12 = scmp.lt.s32.totalorder %s28_s24, %s28_s24 }
  0x1b   :  { %p313_p11 = scmp.ne.s32.totalorder %s28_s24, %s312_s4  ;;  %p318_p13 = scmp.lt.s32.totalorder %s312_s4, %s312_s4 }
  0x1d   :  { %p319_p0 = por %p318_p13, %p317_p12 }
  0x1f   :  { %p320_p1 = pnand %p319_p0, %p313_p11 }
  0x21   :  { %323 = shalt.err (!%p320_p1)
}
  0x22   :  { %33 = dma.hbm_to_vmem [thread:$0]  %s417_s1, 256, %s28_s24, [#allocation10], %s353_s19, %s353_s19, %s354_s20  }
  0x23   :  { %346 = dma.done.wait [#allocation7], 256  }
  0x24   :  { %347 = vsyncadd [#allocation7], 4294967040 }
  0x25   :  { %348 = dma.done.wait [#allocation10], 256  }
  0x26   :  { %349 = vsyncadd [#allocation10], 4294967040  ;;  %v54_v0 = vld [vmem:[#allocation9] sm:$0xff]  ;;  %v52_v1 = vld [vmem:[#allocation6] sm:$0xff]  ;;  %v137_v44 = vlaneseq  ;;  %vm147_vm4 = vcmask 1041409   ;;  %vm150_vm5 = vcmask 58368  }
  0x27   :  { %206 = vadd.xlane.f32.xlu1 %v54_v0  ;;  %v56_v2 = vand.u32 2147483647, %v52_v1  ;;  %v53_v3 = vld [vmem:[#allocation6 + $0x8] sm:$0xff]  ;;  %v55_v4 = vld [vmem:[#allocation9 + $0x8] sm:$0xff]  ;;  %vm96_vm0 = vcmp.ge.f32.partialorder %v52_v1, 0.0  ;;  %v68_v32 = vmul.f32 %v54_v0, %v52_v1  ;;  %v66_v34 = vmax.f32 %v52_v1, 0.0 }
  0x28   :  { %v57_v5 = vand.u32 2147483647, %v53_v3  ;;  %vm97_vm1 = vcmp.ge.f32.partialorder %v53_v3, 0.0  ;;  %v69_v17 = vmul.f32 %v55_v4, %v53_v3  ;;  %v67_v19 = vmax.f32 %v53_v3, 0.0  ;;  %s356_s1 = smov [#allocation11]  }
  0x29   :  { %v58_v6 = vsub.f32 0.0, %v56_v2  ;;  %v70_v41 = vsub.f32 %v66_v34, %v68_v32  ;;  %v138_v45 = vand.u32 127, %v137_v44  ;;  %v140_v46 = vshrl.u32 %v137_v44, 7  ;;  %s251_s6 = sshll.u32 %s356_s1, 4  ;;  %s252_s6 = int_to_ptr.vmem [resolvable:$true] %s251_s6 }
  0x2a   :  { %v59_v7 = vsub.f32 0.0, %v57_v5  ;;  %v71_v30 = vsub.f32 %v67_v19, %v69_v17  ;;  %vm154_vm6 = vcmask 1041408   ;;  %vm243_vm7 = vcmask 0   ;;  %s324_s7 = scalar_lea.vmem %s252_s6, 16  ;;  %s328_s8 = scalar_lea.vmem %s252_s6, 32 }
  0x2b   :  { %v60_v8 = vmul.f32 1.442695, %v58_v6  ;;  %208 = vadd.xlane.f32.xlu1 %v55_v4  ;;  %v141_v47 = vsub.s32 %v138_v45, %v140_v46  ;;  %p325_p2 = scmp.ne.s32.totalorder %s252_s6, %s324_s7  ;;  %p329_p3 = scmp.lt.s32.totalorder %s252_s6, %s252_s6 }
  0x2c   :  { %v62_v9 = vmul.f32 1.442695, %v59_v7  ;;  %p330_p4 = scmp.lt.s32.totalorder %s328_s8, %s324_s7 }
  0x2d   :  { %266 = vpow2.f32 %v60_v8 }
  0x2e   :  { %268 = vpow2.f32 %v62_v9  ;;  %p331_p5 = por %p330_p4, %p329_p3 }
  0x30   :  { %p332_p6 = pnand %p331_p5, %p325_p2 }
  0x37   :  { %v267_v10 = vpop.eup %266 }
  0x38   :  { %v269_v11 = vpop.eup %268  ;;  %v72_v12 = vadd.f32 1.0, %v267_v10  ;;  %v75_v15 = vmul.f32 -0.5, %v267_v10  ;;  %v98_v18 = vsel %vm96_vm0, 1.0, %v267_v10  ;;  %v78_v27 = vand.u32 2147483647, %v267_v10 }
  0x39   :  { %v81_v13 = vadd.f32 1.0, %v269_v11  ;;  %v84_v14 = vmul.f32 -0.5, %v269_v11  ;;  %v87_v20 = vand.u32 2147483647, %v269_v11  ;;  %v99_v21 = vsel %vm97_vm1, 1.0, %v269_v11 }
  0x3a   :  { %270 = vrcp.f32 %v72_v12  ;;  %v76_v23 = vadd.f32 1.0, %v75_v15  ;;  %vm79_vm3 = vcmp.lt.f32.partialorder %v78_v27, 0.0004427343 }
  0x3b   :  { %272 = vrcp.f32 %v81_v13  ;;  %v85_v16 = vadd.f32 1.0, %v84_v14  ;;  %vm88_vm2 = vcmp.lt.f32.partialorder %v87_v20, 0.0004427343 }
  0x3c   :  { %274 = vlog2.f32 %v81_v13  ;;  %v77_v37 = vmul.f32 %v267_v10, %v76_v23 }
  0x3d   :  { %276 = vlog2.f32 %v72_v12  ;;  %v86_v26 = vmul.f32 %v269_v11, %v85_v16 }
  0x44   :  { %v271_v22 = vpop.eup %270 }
  0x45   :  { %v273_v24 = vpop.eup %272  ;;  %v103_v25 = vmul.f32 %v271_v22, %v98_v18 }
  0x46   :  { %v275_v28 = vpop.eup %274  ;;  %v105_v29 = vmul.f32 %v273_v24, %v99_v21 }
  0x47   :  { %v277_v31 = vpop.eup %276  ;;  %185 = vadd.xlane.f32.xlu0 %v103_v25  ;;  %v83_v33 = vmul.f32 0.6931472, %v275_v28  ;;  %v108_v40 = vmul.f32 %v103_v25, %v54_v0 }
  0x48   :  { %v109_v35 = vmul.f32 %v105_v29, %v55_v4  ;;  %v74_v36 = vmul.f32 0.6931472, %v277_v31 }
  0x49   :  { %v89_v38 = vsel %vm88_vm2, %v86_v26, %v83_v33 }
  0x4a   :  { %166 = vadd.xlane.f32.xlu1 %v109_v35  ;;  %v91_v39 = vadd.f32 %v89_v38, %v71_v30  ;;  %v80_v42 = vsel %vm79_vm3, %v77_v37, %v74_v36 }
  0x4b   :  { %187 = vadd.xlane.f32.xlu0 %v105_v29  ;;  %v90_v43 = vadd.f32 %v80_v42, %v70_v41 }
  0x4e   :  { %133 = vadd.xlane.f32.xlu1 %v91_v39 }
  0x4f   :  { %164 = vadd.xlane.f32.xlu0 %v108_v40 }
  0x53   :  { %131 = vadd.xlane.f32.xlu0 %v90_v43 }
  0xb4   :  { %v207_v48 = vpop.xlane.xlu1 %206 }
  0xb5   :  { %v215_v49 = vrot.slane %v207_v48, %v141_v47 }
  0xb8   :  { %v209_v50 = vpop.xlane.xlu1 %208 }
  0xb9   :  { %v219_v51 = vrot.slane %v209_v50, %v141_v47 }
  0xbb   :  { %v220_v52 = vsel %vm147_vm4, %v219_v51, %v215_v49 }
  0xbc   :  { %v222_v53 = vsel %vm150_vm5, %v220_v52, 0.0 }
  0xbd   :  { %223 = vadd.xlane.f32.xlu1 %v222_v53 }
  0xd4   :  { %v186_v54 = vpop.xlane.xlu0 %185 }
  0xd5   :  { %v194_v57 = vrot.slane %v186_v54, %v141_v47 }
  0xd7   :  { %v167_v55 = vpop.xlane.xlu1 %166 }
  0xd8   :  { %v188_v56 = vpop.xlane.xlu0 %187  ;;  %v177_v60 = vrot.slane %v167_v55, %v141_v47 }
  0xd9   :  { %v198_v58 = vrot.slane %v188_v56, %v141_v47 }
  0xdb   :  { %v199_v59 = vsel %vm147_vm4, %v198_v58, %v194_v57  ;;  %v134_v63 = vpop.xlane.xlu1 %133 }
  0xdc   :  { %v201_v61 = vsel %vm150_vm5, %v199_v59, 0.0  ;;  %v165_v62 = vpop.xlane.xlu0 %164  ;;  %v146_v1 = vrot.slane %v134_v63, %v141_v47 }
  0xdd   :  { %202 = vadd.xlane.f32.xlu0 %v201_v61  ;;  %v173_v0 = vrot.slane %v165_v62, %v141_v47 }
  0xdf   :  { %v178_v2 = vsel %vm147_vm4, %v177_v60, %v173_v0 }
  0xe0   :  { %v132_v3 = vpop.xlane.xlu0 %131  ;;  %v180_v4 = vsel %vm150_vm5, %v178_v2, 0.0 }
  0xe1   :  { %v142_v5 = vrot.slane %v132_v3, %v141_v47  ;;  %181 = vadd.xlane.f32.xlu0 %v180_v4 }
  0xe3   :  { %v148_v6 = vsel %vm147_vm4, %v146_v1, %v142_v5 }
  0xe4   :  { %v151_v7 = vsel %vm150_vm5, %v148_v6, 0.0 }
  0xe5   :  { %152 = vadd.xlane.f32.xlu1 %v151_v7 }
 0x14a   :  { %v224_v8 = vpop.xlane.xlu1 %223 }
 0x16a   :  { %v203_v9 = vpop.xlane.xlu0 %202 }
 0x16b   :  { %v227_v10 = vadd.f32 %v224_v8, %v203_v9 }
 0x16d   :  { %v228_v11 = vadd.f32 1e-05, %v227_v10 }
 0x16e   :  { %v182_v12 = vpop.xlane.xlu0 %181 }
 0x16f   :  { %278 = vrcp.f32 %v228_v11  ;;  %v225_v14 = vmul.f32 2.0, %v182_v12 }
 0x171   :  { %v226_v18 = vadd.f32 1e-05, %v225_v14 }
 0x172   :  { %v153_v13 = vpop.xlane.xlu1 %152 }
 0x173   :  { %v155_v15 = vsel %vm154_vm6, %v153_v13, 0.0 }
 0x174   :  { %v156_v16 = vrot.slane %v155_v15, 4 }
 0x176   :  { %v157_v17 = vadd.f32 %v156_v16, %v155_v15 }
 0x178   :  { %v158_v19 = vrot.slane %v157_v17, 2 }
 0x179   :  { %v279_v20 = vpop.eup %278 }
 0x17a   :  { %v230_v21 = vmul.f32 %v279_v20, %v226_v18  ;;  %v159_v22 = vadd.f32 %v158_v19, %v157_v17 }
 0x17c   :  { %v231_v23 = vsel %vm154_vm6, %v230_v21, 0.0  ;;  %v160_v25 = vrot.slane %v159_v22, 1 }
 0x17d   :  { %v232_v24 = vrot.slane %v231_v23, 4 }
 0x17e   :  { %v161_v28 = vadd.f32 %v160_v25, %v159_v22 }
 0x17f   :  { %v233_v26 = vadd.f32 %v232_v24, %v231_v23 }
 0x180   :  { %v240_v31 = vmul.f32 0.00048828125, %v161_v28 }
 0x181   :  { %v234_v27 = vrot.slane %v233_v26, 2 }
 0x182   :  { %v241_v34 = vmul.f32 0.5, %v240_v31 }
 0x183   :  { %v235_v29 = vadd.f32 %v234_v27, %v233_v26 }
 0x185   :  { %v236_v30 = vrot.slane %v235_v29, 1 }
 0x187   :  { %v237_v32 = vadd.f32 %v236_v30, %v235_v29 }
 0x189   :  { %v238_v33 = vmul.f32 0.5, %v237_v32 }
 0x18b   :  { %v239_v35 = vsub.f32 1.0, %v238_v33 }
 0x18d   :  { %v242_v36 = vadd.f32 %v241_v34, %v239_v35 }
 0x18f   :  { %244 = vst.msk [vmem:[#allocation11] sm:$0x1] %vm243_vm7, %v242_v36 }
 0x190   :  { %335 = shalt.err (!%p332_p6)
}
 0x191   :  { %s336_s11 = scalar_lea.hbm %s418_s2, 16 }
 0x192   :  { %p337_p7 = scmp.ne.s32.totalorder %s418_s2, %s336_s11  ;;  %p340_p8 = scmp.lt.u32.totalorder %s336_s11, %s418_s2 }
 0x194   :  { %p342_p9 = pnand %p340_p8, %p337_p7 }
 0x196   :  { %345 = shalt.err (!%p342_p9)
}
 0x197   :  { %254 = dma.vmem_to_hbm [thread:$0]  %s252_s6, 16, %s418_s2, [#allocation8]  }
 0x198   :  { %350 = dma.done.wait [#allocation8], 16  }
 0x199   :  { %351 = vsyncadd [#allocation8], 4294967280 }
 0x19a   :  { %258 = vsyncpa [#allocation7], 1 }
 0x19b   :  { %259 = vsyncpa [#allocation10], 1 }
 0x19c   :  { %260 = vsyncpa [#allocation8], 1 }

</bundles_post_ra>
